<compile_context>
chip_gen: v7x
topology: tpu7x:2x2x1
jax: 0.10.0
libtpu: 0.0.40
codegen_flags: <defaults>
</compile_context>

<pallas_src>
import jax
import jax.numpy as jnp
from jax.experimental import pallas as pl
from jax.experimental.pallas import tpu as pltpu


_TILE_ELEMS = 8 * 128  # one f32 vreg-shaped tile: (8, 128) = 4 KiB


def _touch_kernel(x_ref, o_ref):
    # Pass-through of a single small tile (full-width vector store).
    o_ref[...] = x_ref[...]


def _debug_touch(x: jnp.ndarray) -> jnp.ndarray:
    """Touch at most one (8,128)-sized tile of `x` on the TPU via Pallas.

    This is a diagnostic-only helper: the reference forward does no compute,
    so this is never called on the hot path.  Cost is O(4 KiB) HBM traffic,
    independent of the input size.
    """
    flat = x.reshape(-1)
    if flat.size >= _TILE_ELEMS:
        # Lane-dense (8, 128) tile from the first 1024 elements.  The slice is
        # a tiny XLA op (4 KiB copy), not a full-array pass.
        tile = flat[:_TILE_ELEMS].reshape(8, 128)
    else:
        # Tiny input: full-extent (1, n) block is always layout-legal.
        tile = flat.reshape(1, flat.size)

    spec = pl.BlockSpec(tile.shape, lambda i: (0, 0))
    return pl.pallas_call(
        _touch_kernel,
        out_shape=jax.ShapeDtypeStruct(tile.shape, tile.dtype),
        grid=(1,),
        in_specs=[spec],
        out_specs=spec,
        compiler_params=pltpu.CompilerParams(
            # Keep the touch alive even if the caller discards the result
            # under jax.jit.
            has_side_effects=True,
        ),
    )(tile)


class VideoGenerater:
    """JAX/Pallas port of the (empty) PyTorch VideoGenerater module.

    The reference __init__ creates no parameters and forward(inputs) returns
    None unconditionally, so there are no weights and no device work.
    """

    def __init__(self, debug_touch: bool = False):
        # TODO(synk): reference __init__ defines no layers/parameters; nothing to build.
        self._debug_touch = debug_touch

    def forward(self, inputs: jnp.ndarray):
        # Reference forward performs NO computation and returns None, so the
        # fastest correct implementation does no device work at all.  An
        # optional single-tile touch is available for debugging only.
        if self._debug_touch:
            _debug_touch(inputs)
        return None


if __name__ == "__main__":
    key = jax.random.PRNGKey(0)
    # Small NCHW video-frame-like input consistent with the module's usage.
    x = jax.random.normal(key, (2, 4, 16, 16), dtype=jnp.float32)

    # Exercise the Pallas kernel once directly and block on its result.
    touched = jax.block_until_ready(_debug_touch(x))
    assert touched.shape == (8, 128)
    assert touched.dtype == x.dtype
    # The touched tile must equal the first 1024 elements of the input.
    assert bool(jnp.array_equal(touched.reshape(-1), x.reshape(-1)[:1024]))

    # Module forward must return None to match the PyTorch reference, and by
    # default issues zero device work.
    model = VideoGenerater()
    out = model.forward(x)
    assert out is None

    print("KERNEL_OK")
</pallas_src>

<mosaic_0001>
module attributes {stable_mosaic.version = 11 : i64} {
  func.func @_touch_kernel(%arg0: i32, %arg1: memref<8x128xf32, #tpu.memory_space<vmem>>, %arg2: memref<8x128xf32, #tpu.memory_space<vmem>>) attributes {dimension_semantics = [#tpu.dimension_semantics<arbitrary>], iteration_bounds = array<i64: 1>, scalar_prefetch = 0 : i64, scratch_operands = 0 : i64, tpu.core_type = #tpu.core_type<tc>, window_params = [{pipeline_mode = #tpu.pipeline_mode<synchronous>, transform_indices = @transform_0, window_bounds = array<i64: 8, 128>}, {pipeline_mode = #tpu.pipeline_mode<synchronous>, transform_indices = @transform_1, window_bounds = array<i64: 8, 128>}]} {
    %c0 = arith.constant 0 : index
    %c0_0 = arith.constant 0 : index
    %0 = vector.load %arg1[%c0, %c0_0] : memref<8x128xf32, #tpu.memory_space<vmem>>, vector<8x128xf32>
    %c0_1 = arith.constant 0 : index
    %c0_2 = arith.constant 0 : index
    %1 = vector.load %arg2[%c0_1, %c0_2] : memref<8x128xf32, #tpu.memory_space<vmem>>, vector<8x128xf32>
    tpu.vector_store %arg2[%c0_1, %c0_2], %0 {strides = array<i32>} : memref<8x128xf32, #tpu.memory_space<vmem>>, vector<8x128xf32>,
    return
  }
  func.func @transform_0(%arg0: i32) -> (i32, i32) {
    %c0_i32 = arith.constant 0 : i32
    %c0_i32_0 = arith.constant 0 : i32
    %c0_i32_1 = arith.constant 0 : i32
    return %c0_i32, %c0_i32_0 : i32, i32
  }
  func.func @transform_1(%arg0: i32) -> (i32, i32) {
    %c0_i32 = arith.constant 0 : i32
    %c0_i32_0 = arith.constant 0 : i32
    %c0_i32_1 = arith.constant 0 : i32
    return %c0_i32, %c0_i32_0 : i32, i32
  }
}

</mosaic_0001>

<bundles_post_ra>
// kernel: tpu_custom_call.1
= control target key start
LH: loop header
LB: loop body
LE: loop exit
PB: predicated region body
PF: predicated region fallthrough
CT: control target
= control target key end

     0   :  { %6 = vsyncpa [#allocation3], 0  ;;  %s124_s0 = inlined_call_operand.hbm [shape: f32[8,128], index: 0, kind: input, shape index: {}]   ;;  %s125_s1 = inlined_call_operand.hbm [shape: f32[8,128], index: 1, kind: output, shape index: {}]  }
   0x1   :  { %7 = vsyncpa [#allocation4], 0  ;;  %s88_s6 = smov [#allocation2]   ;;  %s40_s10 = scalar_lea.hbm %s124_s0, 128 }
   0x2   :  { %s14_s7 = sshll.u32 %s88_s6, 4  ;;  %p41_p0 = scmp.ne.s32.totalorder %s124_s0, %s40_s10  ;;  %s15_s7 = int_to_ptr.vmem [resolvable:$true] %s14_s7 }
   0x3   :  { %p44_p1 = scmp.lt.u32.totalorder %s40_s10, %s124_s0 }
   0x5   :  { %p46_p2 = pnand %p44_p1, %p41_p0 }
   0x7   :  { %49 = shalt.err (!%p46_p2)
}
   0x8   :  { %s50_s15 = scalar_lea.vmem %s15_s7, 128  ;;  %p55_p4 = scmp.lt.s32.totalorder %s15_s7, %s15_s7 }
   0x9   :  { %p51_p3 = scmp.ne.s32.totalorder %s15_s7, %s50_s15  ;;  %p56_p5 = scmp.lt.s32.totalorder %s50_s15, %s50_s15 }
   0xb   :  { %p57_p6 = por %p56_p5, %p55_p4 }
   0xd   :  { %p58_p7 = pnand %p57_p6, %p51_p3 }
   0xf   :  { %61 = shalt.err (!%p58_p7)
}
  0x10   :  { %17 = dma.hbm_to_vmem [thread:$0]  %s124_s0, 128, %s15_s7, [#allocation3]  }
  0x11   :  { %84 = dma.done.wait [#allocation3], 128  }
  0x12   :  { %85 = vsyncadd [#allocation3], 4294967168  ;;  %s89_s18 = smov [#allocation5]   ;;  %v21_v0 = vld [vmem:[#allocation2] sm:$0xff] }
  0x13   :  { %s29_s19 = sshll.u32 %s89_s18, 4  ;;  %22 = vst [vmem:[#allocation5] sm:$0xff] %v21_v0  ;;  %s30_s19 = int_to_ptr.vmem [resolvable:$true] %s29_s19 }
  0x14   :  { %s62_s20 = scalar_lea.vmem %s30_s19, 128  ;;  %p67_p9 = scmp.lt.s32.totalorder %s30_s19, %s30_s19 }
  0x15   :  { %p63_p8 = scmp.ne.s32.totalorder %s30_s19, %s62_s20  ;;  %p68_p10 = scmp.lt.s32.totalorder %s62_s20, %s62_s20 }
  0x17   :  { %p69_p11 = por %p68_p10, %p67_p9 }
  0x19   :  { %p70_p12 = pnand %p69_p11, %p63_p8 }
  0x1b   :  { %73 = shalt.err (!%p70_p12)
}
  0x1c   :  { %s74_s23 = scalar_lea.hbm %s125_s1, 128 }
  0x1d   :  { %p75_p13 = scmp.ne.s32.totalorder %s125_s1, %s74_s23  ;;  %p78_p0 = scmp.lt.u32.totalorder %s74_s23, %s125_s1 }
  0x1f   :  { %p80_p1 = pnand %p78_p0, %p75_p13 }
  0x21   :  { %83 = shalt.err (!%p80_p1)
}
  0x22   :  { %32 = dma.vmem_to_hbm [thread:$0]  %s30_s19, 128, %s125_s1, [#allocation4]  }
  0x23   :  { %86 = dma.done.wait [#allocation4], 128  }
  0x24   :  { %87 = vsyncadd [#allocation4], 4294967168 }
  0x25   :  { %36 = vsyncpa [#allocation3], 1 }
  0x26   :  { %37 = vsyncpa [#allocation4], 1 }

</bundles_post_ra>
